<compile_context>
chip_gen: v5e
topology: v5e:2x2
jax: 0.10.0
libtpu: 0.0.40
codegen_flags: <defaults>
</compile_context>

<pallas_src>
import jax
import jax.numpy as jnp
from jax import lax
from jax.experimental import pallas as pl
from jax.experimental.pallas import tpu as pltpu


def _round_up(x, m):
    return ((x + m - 1) // m) * m


def _head_kernel(x_ref, w1_ref, b1_ref, w2_ref, b2_ref, o_ref):
    """One batch tile.

    x_ref  : (TB, in_dim)   activations, native dtype (bf16 fine, no upcast)
    w1_ref : (hid, in_dim)  dense weight (torch nn.Linear layout), resident
    b1_ref : (hid, 1)       dense bias as a column
    w2_ref : (hid, 1)       proj weight as a column
    b2_ref : (1, 1)         proj bias
    o_ref  : (1, TB)        lane-dense output row for this tile
    """
    # h^T = W1 @ x^T: NT dot_general (contract in_dim of both operands),
    # MXU consumes native dtype, accumulates in f32.
    ht = lax.dot_general(
        w1_ref[...], x_ref[...],
        dimension_numbers=(((1,), (1,)), ((), ())),
        preferred_element_type=jnp.float32)                 # (hid, TB) f32

    # Bias + tanh in f32 (VPU/EUP work stays f32 -> correct/fast on v5e too).
    ht = jnp.tanh(ht + b1_ref[...].astype(jnp.float32))     # (hid, TB)

    # proj (hid -> 1): VPU multiply + sublane reduce instead of an N=1 MXU
    # pass; result is already a lane-dense (1, TB) row.
    out = jnp.sum(ht * w2_ref[...].astype(jnp.float32), axis=0, keepdims=True)
    out = out + b2_ref[...].astype(jnp.float32)             # (1, TB)
    o_ref[...] = out.astype(o_ref.dtype)


def binary_classification_head(x, w1, b1, w2, b2, *, block_b=None):
    """Eval-mode forward of BinaryClassificationHead.

    x : (B, in_dim)
    w1: (hid_dim, in_dim)   -- torch `dense.weight` layout
    b1: (hid_dim,)          -- torch `dense.bias`
    w2: (1, hid_dim) / (hid_dim,) / (hid_dim, 1) -- torch `proj.weight`
    b2: (1,) / scalar       -- torch `proj.bias`
    Returns (B, 1) logits in x.dtype.
    """
    B, in_dim = x.shape
    hid_dim = w1.shape[0]

    # Column layouts so broadcasting is along lanes inside the kernel.
    b1c = jnp.reshape(b1, (hid_dim, 1))
    w2c = jnp.reshape(w2, (hid_dim, 1))
    b2c = jnp.reshape(b2, (1, 1))

    if block_b is None:
        # Large batch tiles amortize the ~0.35us/step overhead while keeping
        # 2x(block_b*in_dim) + weights well inside v7x's 32 MiB scoped VMEM.
        block_b = min(512, _round_up(B, 128))
    block_b = _round_up(block_b, 128)

    b_pad = _round_up(B, block_b)
    if b_pad != B:
        x = jnp.pad(x, ((0, b_pad - B), (0, 0)))
    grid = (b_pad // block_b,)

    out = pl.pallas_call(
        _head_kernel,
        out_shape=jax.ShapeDtypeStruct((1, b_pad), x.dtype),
        grid=grid,
        in_specs=[
            pl.BlockSpec((block_b, in_dim), lambda i: (i, 0)),   # x tile
            pl.BlockSpec((hid_dim, in_dim), lambda i: (0, 0)),   # w1 resident
            pl.BlockSpec((hid_dim, 1), lambda i: (0, 0)),        # b1 resident
            pl.BlockSpec((hid_dim, 1), lambda i: (0, 0)),        # w2 resident
            pl.BlockSpec((1, 1), lambda i: (0, 0)),              # b2 resident
        ],
        out_specs=pl.BlockSpec((1, block_b), lambda i: (0, i)),  # lane-dense
        compiler_params=pltpu.CompilerParams(
            dimension_semantics=("parallel",)),                  # v7x: 2 TCs
    )(x, w1, b1c, w2c, b2c)

    return out.reshape(b_pad, 1)[:B]


def init_params(key, in_dim, hid_dim, dtype=jnp.float32):
    """Torch-layout uniform init (like nn.Linear's bound), cast to `dtype`."""
    k1, k2, k3, k4 = jax.random.split(key, 4)
    bound1 = 1.0 / (in_dim ** 0.5)
    bound2 = 1.0 / (hid_dim ** 0.5)
    w1 = jax.random.uniform(k1, (hid_dim, in_dim), jnp.float32, -bound1, bound1)
    b1 = jax.random.uniform(k2, (hid_dim,), jnp.float32, -bound1, bound1)
    w2 = jax.random.uniform(k3, (1, hid_dim), jnp.float32, -bound2, bound2)
    b2 = jax.random.uniform(k4, (1,), jnp.float32, -bound2, bound2)
    return tuple(a.astype(dtype) for a in (w1, b1, w2, b2))


if __name__ == "__main__":
    # Small but non-trivial shapes: multi-step batch grid (4 tiles) plus a
    # ragged batch (500 -> padded to 512) to exercise the padding path.
    B, in_dim, hid_dim = 500, 96, 64
    dtype = jnp.bfloat16  # bf16 activations/weights: MXU-native, half the HBM bytes

    key = jax.random.PRNGKey(0)
    kx, kp = jax.random.split(key)

    x = jax.random.normal(kx, (B, in_dim), jnp.float32).astype(dtype)
    w1, b1, w2, b2 = init_params(kp, in_dim, hid_dim, dtype)

    out = binary_classification_head(x, w1, b1, w2, b2, block_b=128)
    out = jax.block_until_ready(out)
    assert out.shape == (B, 1)

    # Reference (eval-mode dropout = identity), f32 math on the same
    # bf16-valued inputs.
    xf, w1f, b1f, w2f, b2f = (a.astype(jnp.float32) for a in (x, w1, b1, w2, b2))
    ref = jnp.tanh(xf @ w1f.T + b1f) @ w2f.T + b2f
    err = float(jnp.max(jnp.abs(out.astype(jnp.float32) - ref)))
    assert err < 2e-2, f"max abs err {err}"

    print("KERNEL_OK")
</pallas_src>

<mosaic_0001>
module attributes {stable_mosaic.version = 11 : i64} {
  func.func @_head_kernel(%arg0: i32, %arg1: memref<128x96xbf16, #tpu.memory_space<vmem>>, %arg2: memref<64x96xbf16, #tpu.memory_space<vmem>>, %arg3: memref<64x1xbf16, #tpu.memory_space<vmem>>, %arg4: memref<64x1xbf16, #tpu.memory_space<vmem>>, %arg5: memref<1x1xbf16, #tpu.memory_space<vmem>>, %arg6: memref<1x128xbf16, #tpu.memory_space<vmem>>) attributes {dimension_semantics = [#tpu.dimension_semantics<parallel>], iteration_bounds = array<i64: 4>, scalar_prefetch = 0 : i64, scratch_operands = 0 : i64, tpu.core_type = #tpu.core_type<tc>, window_params = [{transform_indices = @transform_0, window_bounds = array<i64: 128, 96>}, {pipeline_mode = #tpu.pipeline_mode<synchronous>, transform_indices = @transform_1, window_bounds = array<i64: 64, 96>}, {pipeline_mode = #tpu.pipeline_mode<synchronous>, transform_indices = @transform_2, window_bounds = array<i64: 64, 1>}, {pipeline_mode = #tpu.pipeline_mode<synchronous>, transform_indices = @transform_3, window_bounds = array<i64: 64, 1>}, {pipeline_mode = #tpu.pipeline_mode<synchronous>, transform_indices = @transform_4, window_bounds = array<i64: 1, 1>}, {transform_indices = @transform_5, window_bounds = array<i64: 1, 128>}]} {
    %c0 = arith.constant 0 : index
    %c0_0 = arith.constant 0 : index
    %0 = vector.load %arg2[%c0, %c0_0] : memref<64x96xbf16, #tpu.memory_space<vmem>>, vector<64x96xbf16>
    %c0_1 = arith.constant 0 : index
    %c0_2 = arith.constant 0 : index
    %1 = vector.load %arg1[%c0_1, %c0_2] : memref<128x96xbf16, #tpu.memory_space<vmem>>, vector<128x96xbf16>
    %cst = arith.constant dense<0.000000e+00> : vector<64x128xf32>
    %2 = tpu.matmul %0, %1, %cst {dimension_numbers = #tpu.dot_dimension_numbers<[1], [1], [0], [0], [0, 0, 1, 0], [], []>} : vector<64x96xbf16>, vector<128x96xbf16>, vector<64x128xf32> -> vector<64x128xf32>
    %c0_3 = arith.constant 0 : index
    %c0_4 = arith.constant 0 : index
    %3 = vector.load %arg3[%c0_3, %c0_4] : memref<64x1xbf16, #tpu.memory_space<vmem>>, vector<64x1xbf16>
    %4 = arith.extf %3 : vector<64x1xbf16> to vector<64x1xf32>
    %5 = vector.broadcast %4 : vector<64x1xf32> to vector<64x128xf32>
    %6 = arith.addf %2, %5 : vector<64x128xf32>
    %7 = math.tanh %6 : vector<64x128xf32>
    %c0_5 = arith.constant 0 : index
    %c0_6 = arith.constant 0 : index
    %8 = vector.load %arg4[%c0_5, %c0_6] : memref<64x1xbf16, #tpu.memory_space<vmem>>, vector<64x1xbf16>
    %9 = arith.extf %8 : vector<64x1xbf16> to vector<64x1xf32>
    %10 = vector.broadcast %9 : vector<64x1xf32> to vector<64x128xf32>
    %11 = arith.mulf %7, %10 : vector<64x128xf32>
    %cst_7 = arith.constant dense<0.000000e+00> : vector<128xf32>
    %12 = vector.multi_reduction <add>, %11, %cst_7 [0] : vector<64x128xf32> to vector<128xf32>
    %13 = vector.shape_cast %12 : vector<128xf32> to vector<1x128xf32>
    %c0_8 = arith.constant 0 : index
    %c0_9 = arith.constant 0 : index
    %14 = vector.load %arg5[%c0_8, %c0_9] : memref<1x1xbf16, #tpu.memory_space<vmem>>, vector<1x1xbf16>
    %15 = arith.extf %14 : vector<1x1xbf16> to vector<1x1xf32>
    %16 = vector.broadcast %15 : vector<1x1xf32> to vector<1x128xf32>
    %17 = arith.addf %13, %16 : vector<1x128xf32>
    %18 = arith.truncf %17 : vector<1x128xf32> to vector<1x128xbf16>
    %c0_10 = arith.constant 0 : index
    %c0_11 = arith.constant 0 : index
    %19 = vector.load %arg6[%c0_10, %c0_11] : memref<1x128xbf16, #tpu.memory_space<vmem>>, vector<1x128xbf16>
    tpu.vector_store %arg6[%c0_10, %c0_11], %18 {strides = array<i32>} : memref<1x128xbf16, #tpu.memory_space<vmem>>, vector<1x128xbf16>,
    return
  }
  func.func @transform_0(%arg0: i32) -> (i32, i32) {
    %c0_i32 = arith.constant 0 : i32
    %c0_i32_0 = arith.constant 0 : i32
    return %arg0, %c0_i32 : i32, i32
  }
  func.func @transform_1(%arg0: i32) -> (i32, i32) {
    %c0_i32 = arith.constant 0 : i32
    %c0_i32_0 = arith.constant 0 : i32
    %c0_i32_1 = arith.constant 0 : i32
    return %c0_i32, %c0_i32_0 : i32, i32
  }
  func.func @transform_2(%arg0: i32) -> (i32, i32) {
    %c0_i32 = arith.constant 0 : i32
    %c0_i32_0 = arith.constant 0 : i32
    %c0_i32_1 = arith.constant 0 : i32
    return %c0_i32, %c0_i32_0 : i32, i32
  }
  func.func @transform_3(%arg0: i32) -> (i32, i32) {
    %c0_i32 = arith.constant 0 : i32
    %c0_i32_0 = arith.constant 0 : i32
    %c0_i32_1 = arith.constant 0 : i32
    return %c0_i32, %c0_i32_0 : i32, i32
  }
  func.func @transform_4(%arg0: i32) -> (i32, i32) {
    %c0_i32 = arith.constant 0 : i32
    %c0_i32_0 = arith.constant 0 : i32
    %c0_i32_1 = arith.constant 0 : i32
    return %c0_i32, %c0_i32_0 : i32, i32
  }
  func.func @transform_5(%arg0: i32) -> (i32, i32) {
    %c0_i32 = arith.constant 0 : i32
    %c0_i32_0 = arith.constant 0 : i32
    return %c0_i32, %arg0 : i32, i32
  }
}

</mosaic_0001>

<bundles_post_ra>
// kernel: tpu_custom_call.1
= control target key start
LH: loop header
LB: loop body
LE: loop exit
PB: predicated region body
PF: predicated region fallthrough
CT: control target
= control target key end

     0   :  { %s1079_s0 = inlined_call_operand.vmem [shape: bf16[512,96], index: 0, kind: input, shape index: {}]   ;;  %s1080_s1 = inlined_call_operand.vmem [shape: bf16[64,96], index: 1, kind: input, shape index: {}]   ;;  %s1081_s2 = inlined_call_operand.vmem [shape: bf16[64,1], index: 2, kind: input, shape index: {}]   ;;  %s1082_s3 = inlined_call_operand.vmem [shape: bf16[64,1], index: 3, kind: input, shape index: {}]   ;;  %s1083_s4 = inlined_call_operand.<no memory space> [shape: bf16[1,1], index: 4, kind: input, shape index: {}]   ;;  %s1084_s5 = inlined_call_operand.hbm [shape: bf16[1,512], index: 5, kind: output, shape index: {}]  }
   0x1   :  { %v10_v0 = vstv %s1083_s4 }
   0x2   :  { %11 = vst [vmem:[#allocation2] sm:$0x1] %v10_v0 }
   0x3   :  { %12 = vsyncpa [#allocation4], 0 }
   0x4   :  { %14 = vsyncpa [#allocation4 + $0x1], 0  ;;  %s937_s20 = smov 0   ;;  %s939_s21 = smov 0  }
   0x5   :  { %s941_s22 = smov 0   ;;  %s943_s23 = smov 0  }
   0x6 LB: > { %s958_s4 = sadd.s32 4294967295, %s900_s23   ;;  %s604_s24 = sadd.s32 4294967294, %s900_s23   ;;  %s900_s23 = sphi %s943_s23, %s1090_s23   ;;  %s896_s22 = sphi %s941_s22, %s1089_s22   ;;  %s892_s21 = sphi %s939_s21, %s1088_s21   ;;  %s888_s20 = sphi %s937_s20, %s1087_s20  }
   0x7   : > { %s962_s25 = sadd.s32 1, %s900_s23   ;;  %s137_s26 = sadd.s32 1, %s896_s22 }
   0x8   : > { %s134_s27 = ssub.s32 %s900_s23, %s962_s25  ;;  %p147_p0 = scmp.ne.s32.totalorder %s896_s22, %s892_s21 }
   0x9   : > { %p135_p1 = scmp.eq.s32.totalorder %s134_s27, 0  ;;  %p148_p2 = scmp.eq.s32.totalorder %s958_s4, 3 }
   0xa   : > { %p153_p3 = scmp.ne.s32.totalorder %s892_s21, %s888_s20  ;;  %p154_p4 = scmp.eq.s32.totalorder %s604_s24, 3 }
   0xb   : > { %s973_s28 = scalar_select %p135_p1, %s896_s22, %s137_s26  }
   0xc   : > { %p975_p5 = por %p148_p2, %p147_p0  ;;  %p979_p6 = por %p154_p4, %p153_p3 }
   0xd   : > { %p607_p7 = scmp.ge.s32.totalorder %s900_s23, 1  ;;  %p193_p8 = scmp.lt.s32.totalorder %s900_s23, 5 }
   0xf   : > { %p194_p9 = pnand %p607_p7, %p193_p8 }
  0x10   : > { %s608_s6 = sshll.u32 (!%p194_p9), %s958_s4, 4  ;;  %s218_s18 = sand.u32 (!%p194_p9), 1, %s892_s21  }
  0x11   : > { %197 = sbr.rel (%p194_p9) target bundleno = 269 (0x10d), region = 40  ;;  %p221_p10 = scmp.lt.s32.totalorder (!%p194_p9), %s608_s6, 63 }
  0x12   : > { %s545_s26 = scalar_lea.hbm (!%p194_p9), %s1084_s5, %s958_s4  ;;  %s219_s27 = scalar_lea.vmem (!%p194_p9), [#allocation3], %s218_s18 }
  0x13   : > { %s537_s8 = scalar_lea.sflag (!%p194_p9), [#allocation4], %s218_s18  ;;  %s858_s13 = scalar_lea.hbm (!%p194_p9), %s1084_s5, 4 }
  0x16   : > { %s1092_s6 = smov (!%p221_p10, %s608_s6), 63  ;;  %vm366_vm0 = vcmask 785408   ;;  %v677_v9 = vld [vmem:[%s1081_s2] sm:$0xff]   ;;  %v902_v14 = vmov 0   ;;  %v709_v16 = vld [vmem:[%s1081_s2 + $0x10] sm:$0xff]   ;;  %v708_v19 = vld [vmem:[%s1081_s2 + $0x8] sm:$0xff]  }
  0x17   : > { %s609_s7 = sshll.u32 %s1092_s6, 2  ;;  %v678_v10 = vunpack.c.l.bf16 %v677_v9  ;;  %v679_v11 = vunpack.c.h.bf16 %v677_v9  ;;  %779 = vset.pattern.permute.xlu0 %v902_v14  ;;  %790 = vset.pattern.permute.xlu1 %v902_v14  ;;  %v686_v17 = vunpack.c.l.bf16 %v709_v16  ;;  %v687_v18 = vunpack.c.h.bf16 %v709_v16  ;;  %v693_v24 = vld [vmem:[%s1082_s3] sm:$0xff]   ;;  %v712_v25 = vld [vmem:[%s1082_s3 + $0x10] sm:$0xff]   ;;  %v710_v26 = vld [vmem:[%s1081_s2 + $0x18] sm:$0xff]   ;;  %s547_s6 = sshll.u32 %s219_s27, 4  ;;  %s548_s6 = int_to_ptr.vmem [resolvable:$true] %s547_s6 }
  0x18   : > { %s989_s10 = scalar_lea.vmem %s1079_s0, %s609_s7  ;;  %801 = vset.pattern.permute.xlu2 %v902_v14  ;;  %v682_v22 = vunpack.c.l.bf16 %v708_v19  ;;  %v683_v23 = vunpack.c.h.bf16 %v708_v19  ;;  %v711_v27 = vld [vmem:[%s1082_s3 + $0x8] sm:$0xff]   ;;  %v694_v29 = vunpack.c.l.bf16 %v693_v24  ;;  %v695_v30 = vunpack.c.h.bf16 %v693_v24  ;;  %v713_v38 = vld [vmem:[%s1082_s3 + $0x18] sm:$0xff]   ;;  %v517_v48 = vld [vmem:[#allocation2] sm:$0x1]  ;;  %s549_s7 = sshll.u32 %s545_s26, 4  ;;  %s550_s7 = int_to_ptr.hbm [resolvable:$true] %s549_s7 }
  0x19   : > { %v675_v1 = vld [vmem:[%s989_s10 + $0x38] sm:$0xff]  ;;  %v674_v3 = vld [vmem:[%s989_s10 + $0x30] sm:$0xff]  ;;  %v673_v5 = vld [vmem:[%s989_s10 + $0x28] sm:$0xff]  ;;  %v780_v13 = vpack.i.bf16 %v679_v11, %v678_v10  ;;  %v791_v21 = vpack.i.bf16 %v687_v18, %v686_v17  ;;  %v690_v31 = vunpack.c.l.bf16 %v710_v26  ;;  %v698_v32 = vunpack.c.l.bf16 %v711_v27  ;;  %s852_s9 = sshra.s32 %s550_s7, 4  ;;  %s853_s9 = int_to_ptr.hbm [resolvable:$true] %s852_s9 }
  0x1a   : > { %v401_v2 = vsel %vm366_vm0, %v675_v1, 0  ;;  %v398_v4 = vsel %vm366_vm0, %v674_v3, 0  ;;  %v395_v6 = vsel %vm366_vm0, %v673_v5, 0  ;;  %v672_v7 = vld [vmem:[%s989_s10 + $0x20] sm:$0xff]  ;;  %v671_v12 = vld [vmem:[%s989_s10 + $0x18] sm:$0xff]  ;;  %v670_v20 = vld [vmem:[%s989_s10 + $0x10] sm:$0xff]  ;;  %v785_v28 = vpack.i.bf16 %v683_v23, %v682_v22  ;;  %p859_p0 = scmp.lt.s32.totalorder %s853_s9, %s1084_s5 }
  0x1b   : > { %403 = vmatpush.bf16.xpose.msra.mxu0 %v401_v2  ;;  %714 = vmatpush.bf16.xpose.msra.mxu1 %v401_v2  ;;  %v392_v8 = vsel %vm366_vm0, %v672_v7, 0  ;;  %v389_v15 = vsel %vm366_vm0, %v671_v12, 0  ;;  %v702_v33 = vunpack.c.l.bf16 %v712_v25  ;;  %v703_v34 = vunpack.c.h.bf16 %v712_v25  ;;  %v669_v42 = vld [vmem:[%s989_s10 + $0x8] sm:$0xff]  ;;  %v668_v49 = vld [vmem:[%s989_s10] sm:$0xff]  ;;  %v666_v54 = vld [vmem:[%s1080_s1 + $0x10] sm:$0xff]  ;;  %s854_s4 = scalar_lea.hbm %s853_s9, 1 }
  0x1c   : > { %715 = vmatpush.bf16.xpose.msra.mxu2 %v401_v2  ;;  %716 = vmatpush.bf16.xpose.msra.mxu3 %v401_v2  ;;  %v386_v35 = vsel %vm366_vm0, %v670_v20, 0  ;;  %v802_v36 = vpack.i.bf16 %v698_v32, %v690_v31  ;;  %v796_v37 = vpack.i.bf16 %v695_v30, %v694_v29  ;;  %v691_v39 = vunpack.c.h.bf16 %v710_v26  ;;  %v664_v52 = vld [vmem:[%s1080_s1] sm:$0xff]  ;;  %v665_v53 = vld [vmem:[%s1080_s1 + $0x8] sm:$0xff]  ;;  %v667_v55 = vld [vmem:[%s1080_s1 + $0x18] sm:$0xff]  ;;  %p855_p11 = scmp.ne.s32.totalorder %s853_s9, %s854_s4  ;;  %p860_p1 = scmp.lt.s32.totalorder %s858_s13, %s854_s4 }
  0x1d   : > { %781 = vperm.xlu0 %779, %v780_v13   ;;  %792 = vperm.xlu1 %790, %v791_v21   ;;  %v699_v40 = vunpack.c.h.bf16 %v711_v27  ;;  %v812_v41 = vpack.i.bf16 %v703_v34, %v702_v33  ;;  %v706_v43 = vunpack.c.l.bf16 %v713_v38  ;;  %v707_v44 = vunpack.c.h.bf16 %v713_v38 }
  0x1e   : > { %803 = vperm.xlu2 %801, %v802_v36   ;;  %v383_v46 = vsel %vm366_vm0, %v669_v42, 0  ;;  %v518_v50 = vunpack.c.l.bf16 %v517_v48  ;;  %v380_v51 = vsel %vm366_vm0, %v668_v49, 0  ;;  %vm530_vm1 = vcmask 1040384   ;;  %p856_p12 = pnand %p855_p11, %p975_p5  ;;  %p861_p2 = por %p860_p1, %p859_p0 }
  0x1f   : > { %v807_v45 = vpack.i.bf16 %v699_v40, %v691_v39  ;;  %v817_v47 = vpack.i.bf16 %v707_v44, %v706_v43  ;;  %vm531_vm2 = vsmask.f32 256 }
  0x20   : > { %vm532_vm3 = vmand %vm530_vm1, %vm531_vm2  ;;  %p857_p13 = pneg %p856_p12 }
  0x22   : > { %p862_p3 = pnand %p861_p2, %p857_p13 }
  0x23   : > { %404 = vmatpush.bf16.xpose.msra.mxu0 %v398_v4  ;;  %717 = vmatpush.bf16.xpose.msra.mxu1 %v398_v4 }
  0x24   : > { %718 = vmatpush.bf16.xpose.msra.mxu2 %v398_v4  ;;  %719 = vmatpush.bf16.xpose.msra.mxu3 %v398_v4 }
  0x25   : > { %786 = vperm.xlu0 %779, %v785_v28   ;;  %797 = vperm.xlu1 %790, %v796_v37  }
  0x26   : > { %808 = vperm.xlu2 %801, %v807_v45  }
  0x2b   : > { %405 = vmatpush.bf16.xpose.msra.mxu0 %v395_v6  ;;  %720 = vmatpush.bf16.xpose.msra.mxu1 %v395_v6 }
  0x2c   : > { %721 = vmatpush.bf16.xpose.msra.mxu2 %v395_v6  ;;  %722 = vmatpush.bf16.xpose.msra.mxu3 %v395_v6 }
  0x2d   : > { %813 = vperm.xlu0 %779, %v812_v41   ;;  %818 = vperm.xlu1 %790, %v817_v47  }
  0x2e   : > { %521 = vperm.xlu2 %801, %v518_v50  }
  0x33   : > { %406 = vmatpush.bf16.xpose.msra.mxu0 %v392_v8  ;;  %723 = vmatpush.bf16.xpose.msra.mxu1 %v392_v8 }
  0x34   : > { %724 = vmatpush.bf16.xpose.msra.mxu2 %v392_v8  ;;  %725 = vmatpush.bf16.xpose.msra.mxu3 %v392_v8 }
  0x3b   : > { %407 = vmatpush.bf16.xpose.msra.mxu0 %v389_v15  ;;  %726 = vmatpush.bf16.xpose.msra.mxu1 %v389_v15 }
  0x3c   : > { %727 = vmatpush.bf16.xpose.msra.mxu2 %v389_v15  ;;  %728 = vmatpush.bf16.xpose.msra.mxu3 %v389_v15 }
  0x43   : > { %408 = vmatpush.bf16.xpose.msra.mxu0 %v386_v35  ;;  %729 = vmatpush.bf16.xpose.msra.mxu1 %v386_v35 }
  0x44   : > { %730 = vmatpush.bf16.xpose.msra.mxu2 %v386_v35  ;;  %731 = vmatpush.bf16.xpose.msra.mxu3 %v386_v35 }
  0x4b   : > { %409 = vmatpush.bf16.xpose.msra.mxu0 %v383_v46  ;;  %732 = vmatpush.bf16.xpose.msra.mxu1 %v383_v46 }
  0x4c   : > { %733 = vmatpush.bf16.xpose.msra.mxu2 %v383_v46  ;;  %734 = vmatpush.bf16.xpose.msra.mxu3 %v383_v46 }
  0x53   : > { %410 = vmatpush.bf16.xpose.msra.mxu0 %v380_v51  ;;  %735 = vmatpush.bf16.xpose.msra.mxu1 %v380_v51 }
  0x54   : > { %736 = vmatpush.bf16.xpose.msra.mxu2 %v380_v51  ;;  %737 = vmatpush.bf16.xpose.msra.mxu3 %v380_v51 }
  0x5a   : > { %658 = vmatmul.msk.bf16.vlgmr.msra.gmra.mxu0 %vm366_vm0, %v664_v52  ;;  %659 = vmatmul.msk.bf16.vlgmr.msra.gmra.mxu1 %vm366_vm0, %v665_v53 }
  0x5b   : > { %660 = vmatmul.msk.bf16.vlgmr.msra.gmra.mxu2 %vm366_vm0, %v666_v54  ;;  %661 = vmatmul.msk.bf16.vlgmr.msra.gmra.mxu3 %vm366_vm0, %v667_v55 }
  0x78   : > { %v804_v63 = vpop.permute.xlu2 %803 }
  0x79   : > { %v805_v11 = vunpack.i.l.bf16 %v804_v63  ;;  %v806_v24 = vunpack.i.h.bf16 %v804_v63 }
  0x80   : > { %v809_v15 = vpop.permute.xlu2 %808 }
  0x81   : > { %v810_v20 = vunpack.i.l.bf16 %v809_v15  ;;  %v811_v33 = vunpack.i.h.bf16 %v809_v15 }
  0x8f   : > { %v782_v56 = vpop.permute.xlu0 %781  ;;  %v793_v62 = vpop.permute.xlu1 %792 }
  0x90   : > { %v783_v59 = vunpack.i.l.bf16 %v782_v56  ;;  %v784_v1 = vunpack.i.h.bf16 %v782_v56  ;;  %v794_v5 = vunpack.i.l.bf16 %v793_v62  ;;  %v795_v13 = vunpack.i.h.bf16 %v793_v62  ;;  %v522_v62 = vpop.permute.xlu2 %521 }
  0x91   : > { %v903_v56 = vmov 269488144  }
  0x97   : > { %v787_v60 = vpop.permute.xlu0 %786  ;;  %v798_v14 = vpop.permute.xlu1 %797 }
  0x98   : > { %v788_v61 = vunpack.i.l.bf16 %v787_v60  ;;  %v789_v6 = vunpack.i.h.bf16 %v787_v60  ;;  %v799_v16 = vunpack.i.l.bf16 %v798_v14  ;;  %v800_v25 = vunpack.i.h.bf16 %v798_v14 }
  0x9f   : > { %v814_v31 = vpop.permute.xlu0 %813  ;;  %v819_v40 = vpop.permute.xlu1 %818 }
  0xa0   : > { %v815_v36 = vunpack.i.l.bf16 %v814_v31  ;;  %v816_v41 = vunpack.i.h.bf16 %v814_v31  ;;  %v820_v45 = vunpack.i.l.bf16 %v819_v40  ;;  %v821_v49 = vunpack.i.h.bf16 %v819_v40 }
  0xd7   : > { %v412_v57 = vpop.f32.mrf.mxu0  ;;  %v417_v58 = vpop.f32.mrf.mxu1 }
  0xd8   : > { %v413_v0 = vadd.f32 %v783_v59, %v412_v57  ;;  %v418_v2 = vadd.f32 %v788_v61, %v417_v58  ;;  %v525_v57 = vunpack.c.l.s4 %v903_v56 }
  0xda   : > { %822 = vtanh.f32 %v413_v0  ;;  %v526_v60 = vunpack.c.0.s8 %v525_v57 }
  0xdb   : > { %824 = vtanh.f32 %v418_v2 }
  0xdc   : > { %v527_v0 = vperm.slane %v522_v62, %v526_v60 }
  0xde   : > { %v422_v3 = vpop.f32.mrf.mxu2  ;;  %v427_v4 = vpop.f32.mrf.mxu3 }
  0xdf   : > { %v414_v7 = vpop.f32.mrf.mxu0  ;;  %v419_v8 = vpop.f32.mrf.mxu1  ;;  %v423_v12 = vadd.f32 %v794_v5, %v422_v3  ;;  %v428_v21 = vadd.f32 %v805_v11, %v427_v4  ;;  %v533_v3 = vld [vmem:[%s219_s27] sm:$0x1] }
  0xe0   : > { %v415_v9 = vadd.f32 %v784_v1, %v414_v7  ;;  %v420_v10 = vadd.f32 %v789_v6, %v419_v8  ;;  %v823_v19 = vpop.eup %822 }
  0xe1   : > { %v825_v23 = vpop.eup %824  ;;  %v496_v28 = vmul.f32 %v823_v19, %v799_v16 }
  0xe2   : > { %826 = vtanh.f32 %v415_v9  ;;  %v498_v32 = vmul.f32 %v825_v23, %v806_v24 }
  0xe3   : > { %828 = vtanh.f32 %v420_v10 }
  0xe4   : > { %830 = vtanh.f32 %v423_v12 }
  0xe6   : > { %v424_v17 = vpop.f32.mrf.mxu2  ;;  %v429_v18 = vpop.f32.mrf.mxu3 }
  0xe7   : > { %v425_v22 = vadd.f32 %v795_v13, %v424_v17  ;;  %v430_v27 = vadd.f32 %v810_v20, %v429_v18 }
  0xe8   : > { %v827_v26 = vpop.eup %826 }
  0xe9   : > { %832 = vtanh.f32 %v425_v22  ;;  %v497_v29 = vmul.f32 %v827_v26, %v800_v25  ;;  %v829_v30 = vpop.eup %828 }
  0xea   : > { %834 = vtanh.f32 %v428_v21  ;;  %v831_v35 = vpop.eup %830  ;;  %v499_v37 = vmul.f32 %v829_v30, %v811_v33 }
  0xeb   : > { %v504_v34 = vadd.f32 %v497_v29, %v496_v28  ;;  %836 = vtanh.f32 %v430_v27  ;;  %v500_v42 = vmul.f32 %v831_v35, %v815_v36 }
  0xed   : > { %v505_v38 = vadd.f32 %v504_v34, %v498_v32 }
  0xef   : > { %v833_v39 = vpop.eup %832  ;;  %v506_v43 = vadd.f32 %v505_v38, %v499_v37 }
  0xf0   : > { %v835_v44 = vpop.eup %834  ;;  %v501_v46 = vmul.f32 %v833_v39, %v816_v41 }
  0xf1   : > { %v507_v47 = vadd.f32 %v506_v43, %v500_v42  ;;  %v837_v48 = vpop.eup %836  ;;  %v502_v50 = vmul.f32 %v835_v44, %v820_v45 }
  0xf2   : > { %v503_v52 = vmul.f32 %v837_v48, %v821_v49 }
  0xf3   : > { %v508_v51 = vadd.f32 %v507_v47, %v501_v46 }
  0xf5   : > { %v509_v53 = vadd.f32 %v508_v51, %v502_v50 }
  0xf7   : > { %v510_v54 = vadd.f32 %v509_v53, %v503_v52 }
  0xf9   : > { %v511_v55 = vrot.slane %v510_v54, 4 }
  0xfb   : > { %v512_v58 = vadd.f32 %v511_v55, %v510_v54 }
  0xfd   : > { %v513_v59 = vrot.slane %v512_v58, 2 }
  0xff   : > { %v514_v61 = vadd.f32 %v513_v59, %v512_v58 }
 0x101   : > { %v515_v63 = vrot.slane %v514_v61, 1 }
 0x103   : > { %v516_v1 = vadd.f32 %v515_v63, %v514_v61 }
 0x105   : > { %v528_v2 = vadd.f32 %v527_v0, %v516_v1 }
 0x107   : > { %v529_v4 = vpack.c.bf16 %v528_v2, %v528_v2 }
 0x109   : > { %v534_v5 = vsel %vm532_vm3, %v529_v4, %v533_v3 }
 0x10a   : > { %535 = vst [vmem:[%s219_s27] sm:$0x1] %v534_v5 }
 0x10b   : > { %865 = shalt.err (!%p862_p3)
}
 0x10c   : > { %738 = dma.vmem_to_hbm [thread:$0]  (%p975_p5), %s548_s6, 16, %s550_s7, %s537_s8  }
 0x10d PF: > { %p744_p4 = scmp.ge.s32.totalorder %s900_s23, 2  ;;  %s561_s16 = sand.u32 1, %s888_s20  }
 0x10e   : > { %s562_s10 = scalar_lea.sflag [#allocation4], %s561_s16 }
 0x10f   : > { %p741_p7 = pnand %p744_p4, %p979_p6 }
 0x111   : > { %p742_p8 = pneg %p741_p7 }
 0x113   : > { %883 = dma.done.wait (%p742_p8), %s562_s10, 16  }
 0x114   : > { %885 = vsyncadd (%p742_p8), %s562_s10, 4294967280  ;;  %p17_p9 = scmp.ge.s32.totalorder %s962_s25, 6   ;;  %s1087_s20 = smov %s892_s21 }
 0x115   : > { %s1088_s21 = smov %s896_s22  ;;  %s1089_s22 = smov %s973_s28 }
 0x116   : > { %s1090_s23 = smov %s962_s25  ;;  %19 = sbr.rel (!%p17_p9) target bundleno = 6 (0x6), region = 75 }
 0x11b   :  { %567 = vsyncpa [#allocation4], 1 }
 0x11c   :  { %569 = vsyncpa [#allocation4 + $0x1], 1 }

</bundles_post_ra>
